<compile_context>
chip_gen: v7x
topology: tpu7x:2x2x1
jax: 0.10.0
libtpu: 0.0.40
codegen_flags: <defaults>
</compile_context>

<pallas_src>
import jax
import jax.numpy as jnp
from jax.experimental import pallas as pl
from jax.experimental.pallas import tpu as pltpu


# ---------------------------------------------------------------------------
# Kernel: whole forward pass fused, one batch tile per grid step.
# ---------------------------------------------------------------------------
def model_kernel(
    # batch-tiled inputs (bf16)
    text_ref, audio_ref,
    # block-packed layers 1..4 (audio conv stack || text SubNet + pf1)
    w1a, w1t, b1, w2, b2, w3, b3, w4, b4,
    # heads: pf2 (t_out, lanes 0..5), pf3-with-pf2-folded, pf4 (a_out, lanes 64..69)
    wpf2, bpf2, wfus, bfus, wpf4, bpf4,
    # single merged batch-tiled output (f32, 128 lanes)
    out_ref,
):
    f32 = jnp.float32
    bf16 = jnp.bfloat16

    def lin(x_bf16, w_ref, b_ref):
        # bf16 x bf16 MXU matmul, f32 accumulation, f32 bias add.
        return jnp.dot(x_bf16, w_ref[...], preferred_element_type=f32) + b_ref[...]

    def relu(v):
        return jnp.maximum(v, 0.0)

    # ---- layer 1: conv1(audio) || BN-folded ts1(text), block-column weights ----
    z = relu(
        jnp.dot(audio_ref[...], w1a[...], preferred_element_type=f32)
        + jnp.dot(text_ref[...], w1t[...], preferred_element_type=f32)
        + b1[...]
    )                                               # (TB, 192): [conv1 | ts1]

    # ---- layers 2..4: block-diagonal (conv_i || text-chain layer_i) ----
    z = relu(lin(z.astype(bf16), w2, b2))           # conv2 || ts2   (dropout -> identity)
    z = relu(lin(z.astype(bf16), w3, b3))           # conv3 || ts3
    z4 = relu(lin(z.astype(bf16), w4, b4))          # conv4 || pf1   (TB, 192)
    z4b = z4.astype(bf16)

    # ---- heads ----
    t_out = lin(z4b, wpf2, bpf2)                    # (TB, 128); lanes 0..5 live
    a1 = relu(lin(z4b, wfus, bfus))                 # pf3 with pf2 folded into text rows
    a_out = lin(a1.astype(bf16), wpf4, bpf4)        # (TB, 128); lanes 64..69 live

    out_ref[...] = t_out + a_out                    # disjoint live lanes -> safe merge


# ---------------------------------------------------------------------------
# Parameter construction (deterministic, synthetic) -- f32, already (in, out).
# ---------------------------------------------------------------------------
def make_params(key):
    dims = {
        "c1": (229, 128), "c2": (128, 128), "c3": (128, 128), "c4": (128, 128),
        "ts1": (300, 64), "ts2": (64, 64), "ts3": (64, 64),
        "pf1": (64, 64), "pf2": (64, 6), "pf3": (134, 128), "pf4": (128, 6),
    }
    params = {}
    keys = jax.random.split(key, 2 * len(dims))
    for i, (name, (din, dout)) in enumerate(dims.items()):
        wk, bk = keys[2 * i], keys[2 * i + 1]
        scale = 1.0 / jnp.sqrt(jnp.float32(din))
        params[name + "_w"] = jax.random.normal(wk, (din, dout), jnp.float32) * scale
        params[name + "_b"] = jax.random.normal(bk, (1, dout), jnp.float32) * scale
    # BatchNorm1d(300) eval-mode folded params (gamma=1, beta=0, mean=0, var=1, eps=1e-5)
    eps = 1e-5
    params["bn_scale"] = jnp.full((1, 300), 1.0 / jnp.sqrt(1.0 + eps), jnp.float32)
    params["bn_shift"] = jnp.zeros((1, 300), jnp.float32)
    return params


# ---------------------------------------------------------------------------
# Wrapper-side weight preparation: BN folding, block packing, pf2->pf3 fold.
# ---------------------------------------------------------------------------
def _round_up(x, m):
    return (x + m - 1) // m * m


def prepare_kernel_weights(p):
    f32 = jnp.float32
    bf16 = jnp.bfloat16
    zeros = lambda shape: jnp.zeros(shape, f32)

    # Fold eval-mode BatchNorm into ts1.
    ts1w_f = p["ts1_w"] * p["bn_scale"].T                       # (300, 64)
    ts1b_f = p["bn_shift"] @ p["ts1_w"] + p["ts1_b"]            # (1, 64)

    # Layer 1: audio -> cols 0..127 (conv1), text -> cols 128..191 (ts1).
    w1a = zeros((256, 192)).at[:229, :128].set(p["c1_w"])
    w1t = zeros((384, 192)).at[:300, 128:].set(ts1w_f)
    b1 = jnp.concatenate([p["c1_b"], ts1b_f], axis=1)           # (1, 192)

    def blockdiag(wa, wt, ba, bt):
        w = zeros((192, 192)).at[:128, :128].set(wa).at[128:, 128:].set(wt)
        b = jnp.concatenate([ba, bt], axis=1)                   # (1, 192)
        return w, b

    w2, b2 = blockdiag(p["c2_w"], p["ts2_w"], p["c2_b"], p["ts2_b"])
    w3, b3 = blockdiag(p["c3_w"], p["ts3_w"], p["c3_b"], p["ts3_b"])
    w4, b4 = blockdiag(p["c4_w"], p["pf1_w"], p["c4_b"], p["pf1_b"])

    # t_out head: pf2 reads the text half of z4 (rows 128..191), writes lanes 0..5.
    wpf2 = zeros((192, 128)).at[128:, :6].set(p["pf2_w"])
    bpf2 = zeros((1, 128)).at[:, :6].set(p["pf2_b"])

    # pf3 with pf2 folded: a1 = relu(out @ pf3[:128] + t1 @ (pf2 @ pf3[128:134]) + b').
    pf3_top = p["pf3_w"][:128, :]                                # (128, 128)
    pf3_bot = p["pf3_w"][128:134, :]                             # (6, 128)
    wfus = zeros((192, 128)).at[:128, :].set(pf3_top).at[128:, :].set(p["pf2_w"] @ pf3_bot)
    bfus = p["pf2_b"] @ pf3_bot + p["pf3_b"]                     # (1, 128)

    # a_out head: pf4 shifted to lanes 64..69 (merged single output).
    wpf4 = zeros((128, 128)).at[:, 64:70].set(p["pf4_w"])
    bpf4 = zeros((1, 128)).at[:, 64:70].set(p["pf4_b"])

    c = lambda w: w.astype(bf16)
    return (
        c(w1a), c(w1t), b1, c(w2), b2, c(w3), b3, c(w4), b4,
        c(wpf2), bpf2, c(wfus), bfus, c(wpf4), bpf4,
    )


# ---------------------------------------------------------------------------
# Wrapper
# ---------------------------------------------------------------------------
def model_forward(text_x, audio_x, params, *, max_batch_tile=512):
    f32 = jnp.float32
    bf16 = jnp.bfloat16
    B = text_x.shape[0]

    # Batch tile: balanced across >=2 grid steps for non-tiny batches (engages
    # v7x's second TensorCore, avoids a near-empty padded last tile), capped at
    # max_batch_tile rows; rounded to 16 (bf16 sublane packing).
    n_tiles = max(1, -(-B // max_batch_tile))
    if B >= 32 and n_tiles < 2:
        n_tiles = 2
    TB = _round_up(-(-B // n_tiles), 16)
    B_pad = _round_up(B, TB)
    grid = (B_pad // TB,)

    # bf16 inputs in HBM (halves streamed input bytes); text 300->384, audio 229->256.
    text_p = jnp.zeros((B_pad, 384), bf16).at[:B, :300].set(text_x.astype(bf16))
    audio_p = jnp.zeros((B_pad, 256), bf16).at[:B, :229].set(audio_x.astype(bf16))

    weights = prepare_kernel_weights(params)

    in_specs = [
        pl.BlockSpec((TB, 384), lambda i: (i, 0)),   # text tile
        pl.BlockSpec((TB, 256), lambda i: (i, 0)),   # audio tile
    ] + [
        # weights/biases: resident across the whole grid (constant block index)
        pl.BlockSpec(w.shape, lambda i: (0, 0)) for w in weights
    ]
    out_specs = pl.BlockSpec((TB, 128), lambda i: (i, 0))

    out_pad = pl.pallas_call(
        model_kernel,
        grid=grid,
        out_shape=jax.ShapeDtypeStruct((B_pad, 128), f32),
        in_specs=in_specs,
        out_specs=out_specs,
        compiler_params=pltpu.CompilerParams(
            dimension_semantics=("parallel",),   # shard batch tiles across TCs (v7x megacore)
        ),
    )(text_p, audio_p, *weights)

    # t_out in lanes 0..5, a_out in lanes 64..69.
    return out_pad[:B, :6], out_pad[:B, 64:70]


# ---------------------------------------------------------------------------
# Pure-JAX f32 reference for verification (mirrors PyTorch eval-mode forward).
# ---------------------------------------------------------------------------
def model_forward_ref(text_x, audio_x, p):
    def lin(x, w, b):
        return x @ w + b
    relu = lambda x: jnp.maximum(x, 0.0)
    out = relu(lin(audio_x, p["c1_w"], p["c1_b"]))
    out = relu(lin(out, p["c2_w"], p["c2_b"]))
    out = relu(lin(out, p["c3_w"], p["c3_b"]))
    out = relu(lin(out, p["c4_w"], p["c4_b"]))
    normed = text_x * p["bn_scale"] + p["bn_shift"]
    y1 = relu(lin(normed, p["ts1_w"], p["ts1_b"]))
    y2 = relu(lin(y1, p["ts2_w"], p["ts2_b"]))
    y3 = relu(lin(y2, p["ts3_w"], p["ts3_b"]))
    t1 = relu(lin(y3, p["pf1_w"], p["pf1_b"]))
    t_out = lin(t1, p["pf2_w"], p["pf2_b"])
    fused = jnp.concatenate([out, t_out], axis=1)
    a1 = relu(lin(fused, p["pf3_w"], p["pf3_b"]))
    a_out = lin(a1, p["pf4_w"], p["pf4_b"])
    return t_out, a_out


if __name__ == "__main__":
    key = jax.random.PRNGKey(0)
    k_text, k_audio, k_params = jax.random.split(key, 3)

    batch = 2
    text_x = jax.random.normal(k_text, (batch, 300), jnp.float32)
    audio_x = jax.random.normal(k_audio, (batch, 229), jnp.float32)
    params = make_params(k_params)

    # TODO(synk): training-mode Dropout / batch-statistics BatchNorm not implemented
    # (inference semantics, matching model.eval()); nn.MaxPool1d is declared but unused
    # in forward(), as is audio_subnet.
    t_out, a_out = jax.block_until_ready(model_forward(text_x, audio_x, params))

    t_ref, a_ref = model_forward_ref(text_x, audio_x, params)
    assert t_out.shape == (batch, 6) and a_out.shape == (batch, 6)
    # bf16 matmul operands/inputs (f32 accumulation) vs pure-f32 reference -> modest tolerance.
    assert jnp.allclose(t_out, t_ref, atol=5e-2, rtol=5e-2), jnp.max(jnp.abs(t_out - t_ref))
    assert jnp.allclose(a_out, a_ref, atol=5e-2, rtol=5e-2), jnp.max(jnp.abs(a_out - a_ref))

    print("KERNEL_OK")
</pallas_src>

<mosaic_0001>
module attributes {stable_mosaic.version = 11 : i64} {
  func.func @model_kernel(%arg0: i32, %arg1: memref<16x384xbf16, #tpu.memory_space<vmem>>, %arg2: memref<16x256xbf16, #tpu.memory_space<vmem>>, %arg3: memref<256x192xbf16, #tpu.memory_space<vmem>>, %arg4: memref<384x192xbf16, #tpu.memory_space<vmem>>, %arg5: memref<1x192xf32, #tpu.memory_space<vmem>>, %arg6: memref<192x192xbf16, #tpu.memory_space<vmem>>, %arg7: memref<1x192xf32, #tpu.memory_space<vmem>>, %arg8: memref<192x192xbf16, #tpu.memory_space<vmem>>, %arg9: memref<1x192xf32, #tpu.memory_space<vmem>>, %arg10: memref<192x192xbf16, #tpu.memory_space<vmem>>, %arg11: memref<1x192xf32, #tpu.memory_space<vmem>>, %arg12: memref<192x128xbf16, #tpu.memory_space<vmem>>, %arg13: memref<1x128xf32, #tpu.memory_space<vmem>>, %arg14: memref<192x128xbf16, #tpu.memory_space<vmem>>, %arg15: memref<1x128xf32, #tpu.memory_space<vmem>>, %arg16: memref<128x128xbf16, #tpu.memory_space<vmem>>, %arg17: memref<1x128xf32, #tpu.memory_space<vmem>>, %arg18: memref<16x128xf32, #tpu.memory_space<vmem>>) attributes {dimension_semantics = [#tpu.dimension_semantics<parallel>], iteration_bounds = array<i64: 1>, scalar_prefetch = 0 : i64, scratch_operands = 0 : i64, tpu.core_type = #tpu.core_type<tc>, window_params = [{transform_indices = @transform_0, window_bounds = array<i64: 16, 384>}, {transform_indices = @transform_1, window_bounds = array<i64: 16, 256>}, {pipeline_mode = #tpu.pipeline_mode<synchronous>, transform_indices = @transform_2, window_bounds = array<i64: 256, 192>}, {pipeline_mode = #tpu.pipeline_mode<synchronous>, transform_indices = @transform_3, window_bounds = array<i64: 384, 192>}, {pipeline_mode = #tpu.pipeline_mode<synchronous>, transform_indices = @transform_4, window_bounds = array<i64: 1, 192>}, {pipeline_mode = #tpu.pipeline_mode<synchronous>, transform_indices = @transform_5, window_bounds = array<i64: 192, 192>}, {pipeline_mode = #tpu.pipeline_mode<synchronous>, transform_indices = @transform_6, window_bounds = array<i64: 1, 192>}, {pipeline_mode = #tpu.pipeline_mode<synchronous>, transform_indices = @transform_7, window_bounds = array<i64: 192, 192>}, {pipeline_mode = #tpu.pipeline_mode<synchronous>, transform_indices = @transform_8, window_bounds = array<i64: 1, 192>}, {pipeline_mode = #tpu.pipeline_mode<synchronous>, transform_indices = @transform_9, window_bounds = array<i64: 192, 192>}, {pipeline_mode = #tpu.pipeline_mode<synchronous>, transform_indices = @transform_10, window_bounds = array<i64: 1, 192>}, {pipeline_mode = #tpu.pipeline_mode<synchronous>, transform_indices = @transform_11, window_bounds = array<i64: 192, 128>}, {pipeline_mode = #tpu.pipeline_mode<synchronous>, transform_indices = @transform_12, window_bounds = array<i64: 1, 128>}, {pipeline_mode = #tpu.pipeline_mode<synchronous>, transform_indices = @transform_13, window_bounds = array<i64: 192, 128>}, {pipeline_mode = #tpu.pipeline_mode<synchronous>, transform_indices = @transform_14, window_bounds = array<i64: 1, 128>}, {pipeline_mode = #tpu.pipeline_mode<synchronous>, transform_indices = @transform_15, window_bounds = array<i64: 128, 128>}, {pipeline_mode = #tpu.pipeline_mode<synchronous>, transform_indices = @transform_16, window_bounds = array<i64: 1, 128>}, {transform_indices = @transform_17, window_bounds = array<i64: 16, 128>}]} {
    %c0 = arith.constant 0 : index
    %c0_0 = arith.constant 0 : index
    %0 = vector.load %arg2[%c0, %c0_0] : memref<16x256xbf16, #tpu.memory_space<vmem>>, vector<16x256xbf16>
    %c0_1 = arith.constant 0 : index
    %c0_2 = arith.constant 0 : index
    %1 = vector.load %arg3[%c0_1, %c0_2] : memref<256x192xbf16, #tpu.memory_space<vmem>>, vector<256x192xbf16>
    %cst = arith.constant dense<0.000000e+00> : vector<16x192xf32>
    %2 = tpu.matmul %0, %1, %cst {dimension_numbers = #tpu.dot_dimension_numbers<[1], [0], [0], [1], [0, 0, 1, 1], [], []>} : vector<16x256xbf16>, vector<256x192xbf16>, vector<16x192xf32> -> vector<16x192xf32>
    %c0_3 = arith.constant 0 : index
    %c0_4 = arith.constant 0 : index
    %3 = vector.load %arg1[%c0_3, %c0_4] : memref<16x384xbf16, #tpu.memory_space<vmem>>, vector<16x384xbf16>
    %c0_5 = arith.constant 0 : index
    %c0_6 = arith.constant 0 : index
    %4 = vector.load %arg4[%c0_5, %c0_6] : memref<384x192xbf16, #tpu.memory_space<vmem>>, vector<384x192xbf16>
    %cst_7 = arith.constant dense<0.000000e+00> : vector<16x192xf32>
    %5 = tpu.matmul %3, %4, %cst_7 {dimension_numbers = #tpu.dot_dimension_numbers<[1], [0], [0], [1], [0, 0, 1, 1], [], []>} : vector<16x384xbf16>, vector<384x192xbf16>, vector<16x192xf32> -> vector<16x192xf32>
    %6 = arith.addf %2, %5 : vector<16x192xf32>
    %c0_8 = arith.constant 0 : index
    %c0_9 = arith.constant 0 : index
    %7 = vector.load %arg5[%c0_8, %c0_9] : memref<1x192xf32, #tpu.memory_space<vmem>>, vector<1x192xf32>
    %8 = vector.broadcast %7 : vector<1x192xf32> to vector<16x192xf32>
    %9 = arith.addf %6, %8 : vector<16x192xf32>
    %cst_10 = arith.constant 0.000000e+00 : f32
    %10 = vector.broadcast %cst_10 : f32 to vector<16x192xf32>
    %11 = arith.maximumf %9, %10 : vector<16x192xf32>
    %12 = arith.truncf %11 : vector<16x192xf32> to vector<16x192xbf16>
    %c0_11 = arith.constant 0 : index
    %c0_12 = arith.constant 0 : index
    %13 = vector.load %arg6[%c0_11, %c0_12] : memref<192x192xbf16, #tpu.memory_space<vmem>>, vector<192x192xbf16>
    %cst_13 = arith.constant dense<0.000000e+00> : vector<16x192xf32>
    %14 = tpu.matmul %12, %13, %cst_13 {dimension_numbers = #tpu.dot_dimension_numbers<[1], [0], [0], [1], [0, 0, 1, 1], [], []>} : vector<16x192xbf16>, vector<192x192xbf16>, vector<16x192xf32> -> vector<16x192xf32>
    %c0_14 = arith.constant 0 : index
    %c0_15 = arith.constant 0 : index
    %15 = vector.load %arg7[%c0_14, %c0_15] : memref<1x192xf32, #tpu.memory_space<vmem>>, vector<1x192xf32>
    %16 = vector.broadcast %15 : vector<1x192xf32> to vector<16x192xf32>
    %17 = arith.addf %14, %16 : vector<16x192xf32>
    %cst_16 = arith.constant 0.000000e+00 : f32
    %18 = vector.broadcast %cst_16 : f32 to vector<16x192xf32>
    %19 = arith.maximumf %17, %18 : vector<16x192xf32>
    %20 = arith.truncf %19 : vector<16x192xf32> to vector<16x192xbf16>
    %c0_17 = arith.constant 0 : index
    %c0_18 = arith.constant 0 : index
    %21 = vector.load %arg8[%c0_17, %c0_18] : memref<192x192xbf16, #tpu.memory_space<vmem>>, vector<192x192xbf16>
    %cst_19 = arith.constant dense<0.000000e+00> : vector<16x192xf32>
    %22 = tpu.matmul %20, %21, %cst_19 {dimension_numbers = #tpu.dot_dimension_numbers<[1], [0], [0], [1], [0, 0, 1, 1], [], []>} : vector<16x192xbf16>, vector<192x192xbf16>, vector<16x192xf32> -> vector<16x192xf32>
    %c0_20 = arith.constant 0 : index
    %c0_21 = arith.constant 0 : index
    %23 = vector.load %arg9[%c0_20, %c0_21] : memref<1x192xf32, #tpu.memory_space<vmem>>, vector<1x192xf32>
    %24 = vector.broadcast %23 : vector<1x192xf32> to vector<16x192xf32>
    %25 = arith.addf %22, %24 : vector<16x192xf32>
    %cst_22 = arith.constant 0.000000e+00 : f32
    %26 = vector.broadcast %cst_22 : f32 to vector<16x192xf32>
    %27 = arith.maximumf %25, %26 : vector<16x192xf32>
    %28 = arith.truncf %27 : vector<16x192xf32> to vector<16x192xbf16>
    %c0_23 = arith.constant 0 : index
    %c0_24 = arith.constant 0 : index
    %29 = vector.load %arg10[%c0_23, %c0_24] : memref<192x192xbf16, #tpu.memory_space<vmem>>, vector<192x192xbf16>
    %cst_25 = arith.constant dense<0.000000e+00> : vector<16x192xf32>
    %30 = tpu.matmul %28, %29, %cst_25 {dimension_numbers = #tpu.dot_dimension_numbers<[1], [0], [0], [1], [0, 0, 1, 1], [], []>} : vector<16x192xbf16>, vector<192x192xbf16>, vector<16x192xf32> -> vector<16x192xf32>
    %c0_26 = arith.constant 0 : index
    %c0_27 = arith.constant 0 : index
    %31 = vector.load %arg11[%c0_26, %c0_27] : memref<1x192xf32, #tpu.memory_space<vmem>>, vector<1x192xf32>
    %32 = vector.broadcast %31 : vector<1x192xf32> to vector<16x192xf32>
    %33 = arith.addf %30, %32 : vector<16x192xf32>
    %cst_28 = arith.constant 0.000000e+00 : f32
    %34 = vector.broadcast %cst_28 : f32 to vector<16x192xf32>
    %35 = arith.maximumf %33, %34 : vector<16x192xf32>
    %36 = arith.truncf %35 : vector<16x192xf32> to vector<16x192xbf16>
    %c0_29 = arith.constant 0 : index
    %c0_30 = arith.constant 0 : index
    %37 = vector.load %arg12[%c0_29, %c0_30] : memref<192x128xbf16, #tpu.memory_space<vmem>>, vector<192x128xbf16>
    %cst_31 = arith.constant dense<0.000000e+00> : vector<16x128xf32>
    %38 = tpu.matmul %36, %37, %cst_31 {dimension_numbers = #tpu.dot_dimension_numbers<[1], [0], [0], [1], [0, 0, 1, 1], [], []>} : vector<16x192xbf16>, vector<192x128xbf16>, vector<16x128xf32> -> vector<16x128xf32>
    %c0_32 = arith.constant 0 : index
    %c0_33 = arith.constant 0 : index
    %39 = vector.load %arg13[%c0_32, %c0_33] : memref<1x128xf32, #tpu.memory_space<vmem>>, vector<1x128xf32>
    %40 = vector.broadcast %39 : vector<1x128xf32> to vector<16x128xf32>
    %41 = arith.addf %38, %40 : vector<16x128xf32>
    %c0_34 = arith.constant 0 : index
    %c0_35 = arith.constant 0 : index
    %42 = vector.load %arg14[%c0_34, %c0_35] : memref<192x128xbf16, #tpu.memory_space<vmem>>, vector<192x128xbf16>
    %cst_36 = arith.constant dense<0.000000e+00> : vector<16x128xf32>
    %43 = tpu.matmul %36, %42, %cst_36 {dimension_numbers = #tpu.dot_dimension_numbers<[1], [0], [0], [1], [0, 0, 1, 1], [], []>} : vector<16x192xbf16>, vector<192x128xbf16>, vector<16x128xf32> -> vector<16x128xf32>
    %c0_37 = arith.constant 0 : index
    %c0_38 = arith.constant 0 : index
    %44 = vector.load %arg15[%c0_37, %c0_38] : memref<1x128xf32, #tpu.memory_space<vmem>>, vector<1x128xf32>
    %45 = vector.broadcast %44 : vector<1x128xf32> to vector<16x128xf32>
    %46 = arith.addf %43, %45 : vector<16x128xf32>
    %cst_39 = arith.constant 0.000000e+00 : f32
    %47 = vector.broadcast %cst_39 : f32 to vector<16x128xf32>
    %48 = arith.maximumf %46, %47 : vector<16x128xf32>
    %49 = arith.truncf %48 : vector<16x128xf32> to vector<16x128xbf16>
    %c0_40 = arith.constant 0 : index
    %c0_41 = arith.constant 0 : index
    %50 = vector.load %arg16[%c0_40, %c0_41] : memref<128x128xbf16, #tpu.memory_space<vmem>>, vector<128x128xbf16>
    %cst_42 = arith.constant dense<0.000000e+00> : vector<16x128xf32>
    %51 = tpu.matmul %49, %50, %cst_42 {dimension_numbers = #tpu.dot_dimension_numbers<[1], [0], [0], [1], [0, 0, 1, 1], [], []>} : vector<16x128xbf16>, vector<128x128xbf16>, vector<16x128xf32> -> vector<16x128xf32>
    %c0_43 = arith.constant 0 : index
    %c0_44 = arith.constant 0 : index
    %52 = vector.load %arg17[%c0_43, %c0_44] : memref<1x128xf32, #tpu.memory_space<vmem>>, vector<1x128xf32>
    %53 = vector.broadcast %52 : vector<1x128xf32> to vector<16x128xf32>
    %54 = arith.addf %51, %53 : vector<16x128xf32>
    %55 = arith.addf %41, %54 : vector<16x128xf32>
    %c0_45 = arith.constant 0 : index
    %c0_46 = arith.constant 0 : index
    %56 = vector.load %arg18[%c0_45, %c0_46] : memref<16x128xf32, #tpu.memory_space<vmem>>, vector<16x128xf32>
    tpu.vector_store %arg18[%c0_45, %c0_46], %55 {strides = array<i32>} : memref<16x128xf32, #tpu.memory_space<vmem>>, vector<16x128xf32>,
    return
  }
  func.func @transform_0(%arg0: i32) -> (i32, i32) {
    %c0_i32 = arith.constant 0 : i32
    %c0_i32_0 = arith.constant 0 : i32
    return %arg0, %c0_i32 : i32, i32
  }
  func.func @transform_1(%arg0: i32) -> (i32, i32) {
    %c0_i32 = arith.constant 0 : i32
    %c0_i32_0 = arith.constant 0 : i32
    return %arg0, %c0_i32 : i32, i32
  }
  func.func @transform_2(%arg0: i32) -> (i32, i32) {
    %c0_i32 = arith.constant 0 : i32
    %c0_i32_0 = arith.constant 0 : i32
    %c0_i32_1 = arith.constant 0 : i32
    return %c0_i32, %c0_i32_0 : i32, i32
  }
  func.func @transform_3(%arg0: i32) -> (i32, i32) {
    %c0_i32 = arith.constant 0 : i32
    %c0_i32_0 = arith.constant 0 : i32
    %c0_i32_1 = arith.constant 0 : i32
    return %c0_i32, %c0_i32_0 : i32, i32
  }
  func.func @transform_4(%arg0: i32) -> (i32, i32) {
    %c0_i32 = arith.constant 0 : i32
    %c0_i32_0 = arith.constant 0 : i32
    %c0_i32_1 = arith.constant 0 : i32
    return %c0_i32, %c0_i32_0 : i32, i32
  }
  func.func @transform_5(%arg0: i32) -> (i32, i32) {
    %c0_i32 = arith.constant 0 : i32
    %c0_i32_0 = arith.constant 0 : i32
    %c0_i32_1 = arith.constant 0 : i32
    return %c0_i32, %c0_i32_0 : i32, i32
  }
  func.func @transform_6(%arg0: i32) -> (i32, i32) {
    %c0_i32 = arith.constant 0 : i32
    %c0_i32_0 = arith.constant 0 : i32
    %c0_i32_1 = arith.constant 0 : i32
    return %c0_i32, %c0_i32_0 : i32, i32
  }
  func.func @transform_7(%arg0: i32) -> (i32, i32) {
    %c0_i32 = arith.constant 0 : i32
    %c0_i32_0 = arith.constant 0 : i32
    %c0_i32_1 = arith.constant 0 : i32
    return %c0_i32, %c0_i32_0 : i32, i32
  }
  func.func @transform_8(%arg0: i32) -> (i32, i32) {
    %c0_i32 = arith.constant 0 : i32
    %c0_i32_0 = arith.constant 0 : i32
    %c0_i32_1 = arith.constant 0 : i32
    return %c0_i32, %c0_i32_0 : i32, i32
  }
  func.func @transform_9(%arg0: i32) -> (i32, i32) {
    %c0_i32 = arith.constant 0 : i32
    %c0_i32_0 = arith.constant 0 : i32
    %c0_i32_1 = arith.constant 0 : i32
    return %c0_i32, %c0_i32_0 : i32, i32
  }
  func.func @transform_10(%arg0: i32) -> (i32, i32) {
    %c0_i32 = arith.constant 0 : i32
    %c0_i32_0 = arith.constant 0 : i32
    %c0_i32_1 = arith.constant 0 : i32
    return %c0_i32, %c0_i32_0 : i32, i32
  }
  func.func @transform_11(%arg0: i32) -> (i32, i32) {
    %c0_i32 = arith.constant 0 : i32
    %c0_i32_0 = arith.constant 0 : i32
    %c0_i32_1 = arith.constant 0 : i32
    return %c0_i32, %c0_i32_0 : i32, i32
  }
  func.func @transform_12(%arg0: i32) -> (i32, i32) {
    %c0_i32 = arith.constant 0 : i32
    %c0_i32_0 = arith.constant 0 : i32
    %c0_i32_1 = arith.constant 0 : i32
    return %c0_i32, %c0_i32_0 : i32, i32
  }
  func.func @transform_13(%arg0: i32) -> (i32, i32) {
    %c0_i32 = arith.constant 0 : i32
    %c0_i32_0 = arith.constant 0 : i32
    %c0_i32_1 = arith.constant 0 : i32
    return %c0_i32, %c0_i32_0 : i32, i32
  }
  func.func @transform_14(%arg0: i32) -> (i32, i32) {
    %c0_i32 = arith.constant 0 : i32
    %c0_i32_0 = arith.constant 0 : i32
    %c0_i32_1 = arith.constant 0 : i32
    return %c0_i32, %c0_i32_0 : i32, i32
  }
  func.func @transform_15(%arg0: i32) -> (i32, i32) {
    %c0_i32 = arith.constant 0 : i32
    %c0_i32_0 = arith.constant 0 : i32
    %c0_i32_1 = arith.constant 0 : i32
    return %c0_i32, %c0_i32_0 : i32, i32
  }
  func.func @transform_16(%arg0: i32) -> (i32, i32) {
    %c0_i32 = arith.constant 0 : i32
    %c0_i32_0 = arith.constant 0 : i32
    %c0_i32_1 = arith.constant 0 : i32
    return %c0_i32, %c0_i32_0 : i32, i32
  }
  func.func @transform_17(%arg0: i32) -> (i32, i32) {
    %c0_i32 = arith.constant 0 : i32
    %c0_i32_0 = arith.constant 0 : i32
    return %arg0, %c0_i32 : i32, i32
  }
}

</mosaic_0001>

<bundles_post_ra>
// kernel: tpu_custom_call.1
= control target key start
LH: loop header
LB: loop body
LE: loop exit
PB: predicated region body
PF: predicated region fallthrough
CT: control target
= control target key end

     0   :  { %s3150_s0 = inlined_call_operand.hbm [shape: bf16[16,384], index: 0, kind: input, shape index: {}]   ;;  %s3151_s1 = inlined_call_operand.hbm [shape: bf16[16,256], index: 1, kind: input, shape index: {}]   ;;  %s3152_s2 = inlined_call_operand.vmem [shape: bf16[256,192], index: 2, kind: input, shape index: {}]   ;;  %s3153_s3 = inlined_call_operand.vmem [shape: bf16[384,192], index: 3, kind: input, shape index: {}]   ;;  %s3154_s4 = inlined_call_operand.vmem [shape: f32[1,192], index: 4, kind: input, shape index: {}]   ;;  %s3155_s5 = inlined_call_operand.vmem [shape: bf16[192,192], index: 5, kind: input, shape index: {}]   ;;  %s3156_s6 = inlined_call_operand.vmem [shape: f32[1,192], index: 6, kind: input, shape index: {}]   ;;  %s3157_s7 = inlined_call_operand.vmem [shape: bf16[192,192], index: 7, kind: input, shape index: {}]   ;;  %s3158_s8 = inlined_call_operand.vmem [shape: f32[1,192], index: 8, kind: input, shape index: {}]   ;;  %s3159_s9 = inlined_call_operand.vmem [shape: bf16[192,192], index: 9, kind: input, shape index: {}]   ;;  %s3160_s10 = inlined_call_operand.vmem [shape: f32[1,192], index: 10, kind: input, shape index: {}]   ;;  %s3161_s11 = inlined_call_operand.vmem [shape: bf16[192,128], index: 11, kind: input, shape index: {}]   ;;  %s3162_s12 = inlined_call_operand.vmem [shape: f32[1,128], index: 12, kind: input, shape index: {}]   ;;  %s3163_s13 = inlined_call_operand.vmem [shape: bf16[192,128], index: 13, kind: input, shape index: {}]   ;;  %s3164_s14 = inlined_call_operand.vmem [shape: f32[1,128], index: 14, kind: input, shape index: {}]   ;;  %s3165_s15 = inlined_call_operand.vmem [shape: bf16[128,128], index: 15, kind: input, shape index: {}]   ;;  %s3166_s16 = inlined_call_operand.vmem [shape: f32[1,128], index: 16, kind: input, shape index: {}]   ;;  %s3167_s17 = inlined_call_operand.hbm [shape: f32[16,128], index: 17, kind: output, shape index: {}]  }
   0x1   :  { %3171 = sst [smem:[#allocation11_spill]] %s3150_s0 }
   0x2   :  { %3172 = sst [smem:[#allocation12_spill]] %s3151_s1 }
   0x3   :  { %3173 = sst [smem:[#allocation13_spill]] %s3166_s16 }
   0x4   :  { %3174 = sst [smem:[#allocation14_spill]] %s3167_s17 }
   0x5   :  { %22 = vsyncpa [#allocation3], 0 }
   0x6   :  { %23 = vsyncpa [#allocation6], 0 }
   0x7   :  { %24 = vsyncpa [#allocation4], 0  ;;  %s2393_s24 = smov [#allocation2]   ;;  %s3175_s28 = sld [smem:[#allocation11_spill]] }
   0x8   :  { %s30_s25 = sshll.u32 %s2393_s24, 4  ;;  %s31_s25 = int_to_ptr.vmem [resolvable:$true] %s30_s25 }
   0xd   :  { %s2321_s29 = scalar_lea.hbm %s3175_s28, 384 }
   0xe   :  { %p2322_p0 = scmp.ne.s32.totalorder %s3175_s28, %s2321_s29  ;;  %p2325_p1 = scmp.lt.u32.totalorder %s2321_s29, %s3175_s28 }
  0x10   :  { %p2327_p2 = pnand %p2325_p1, %p2322_p0 }
  0x12   :  { %2330 = shalt.err (!%p2327_p2)
}
  0x13   :  { %s2331_s1 = scalar_lea.vmem %s31_s25, 384  ;;  %p2336_p4 = scmp.lt.s32.totalorder %s31_s25, %s31_s25 }
  0x14   :  { %p2332_p3 = scmp.ne.s32.totalorder %s31_s25, %s2331_s1  ;;  %p2337_p5 = scmp.lt.s32.totalorder %s2331_s1, %s2331_s1 }
  0x16   :  { %p2338_p6 = por %p2337_p5, %p2336_p4 }
  0x18   :  { %p2339_p7 = pnand %p2338_p6, %p2332_p3 }
  0x1a   :  { %2342 = shalt.err (!%p2339_p7)
}
  0x1b   :  { %s2394_s20 = smov 192   ;;  %s2395_s21 = smov 12  }
  0x1c   :  { %36 = dma.hbm_to_vmem [thread:$0]  %s3175_s28, 384, %s31_s25, [#allocation3], %s2394_s20, %s2394_s20, %s2395_s21  }
  0x1d   :  { %s2396_s24 = smov [#allocation5]   ;;  %s3176_s0 = sld [smem:[#allocation12_spill]] }
  0x1e   :  { %s42_s26 = sshll.u32 %s2396_s24, 4  ;;  %s43_s26 = int_to_ptr.vmem [resolvable:$true] %s42_s26 }
  0x23   :  { %s2343_s30 = scalar_lea.hbm %s3176_s0, 256 }
  0x24   :  { %p2344_p8 = scmp.ne.s32.totalorder %s3176_s0, %s2343_s30  ;;  %p2347_p9 = scmp.lt.u32.totalorder %s2343_s30, %s3176_s0 }
  0x26   :  { %p2349_p10 = pnand %p2347_p9, %p2344_p8 }
  0x28   :  { %2352 = shalt.err (!%p2349_p10)
}
  0x29   :  { %s2353_s16 = scalar_lea.vmem %s43_s26, 256  ;;  %p2358_p12 = scmp.lt.s32.totalorder %s43_s26, %s43_s26 }
  0x2a   :  { %p2354_p11 = scmp.ne.s32.totalorder %s43_s26, %s2353_s16  ;;  %p2359_p13 = scmp.lt.s32.totalorder %s2353_s16, %s2353_s16 }
  0x2c   :  { %p2360_p0 = por %p2359_p13, %p2358_p12 }
  0x2e   :  { %p2361_p1 = pnand %p2360_p0, %p2354_p11 }
  0x30   :  { %2364 = shalt.err (!%p2361_p1)
}
  0x31   :  { %s2397_s25 = smov 128   ;;  %s2398_s28 = smov 8  }
  0x32   :  { %48 = dma.hbm_to_vmem [thread:$0]  %s3176_s0, 256, %s43_s26, [#allocation6], %s2397_s25, %s2397_s25, %s2398_s28  }
  0x33   :  { %2387 = dma.done.wait [#allocation3], 384  }
  0x34   :  { %2388 = vsyncadd [#allocation3], 4294966912 }
  0x35   :  { %2389 = dma.done.wait [#allocation6], 256  }
  0x36   :  { %2390 = vsyncadd [#allocation6], 4294967040  ;;  %v2054_v0 = vld [vmem:[%s3153_s3 + $0x4] ss:$8 sps:$4 sm:$0xff]   ;;  %v2056_v1 = vld [vmem:[%s3153_s3] ss:$8 sps:$4 sm:$0xff]  }
  0x37   :  { %428 = vmatprep.subr.bf16.mxu0 %v2054_v0  ;;  %v2057_v2 = vld [vmem:[%s3153_s3 + $0x14] ss:$8 sps:$4 sm:$0xff]   ;;  %v2059_v3 = vld [vmem:[%s3153_s3 + $0x10] ss:$8 sps:$4 sm:$0xff]   ;;  %v2060_v4 = vld [vmem:[%s3153_s3 + $0x24] ss:$8 sps:$4 sm:$0xff]  }
  0x38   :  { %429 = vmatpush1.bf16.msra.mxu0 %v2056_v1  ;;  %v2062_v5 = vld [vmem:[%s3153_s3 + $0x20] ss:$8 sps:$4 sm:$0xff]   ;;  %v2063_v6 = vld [vmem:[%s3153_s3 + $0x34] ss:$8 sps:$4 sm:$0xff]   ;;  %v2065_v7 = vld [vmem:[%s3153_s3 + $0x30] ss:$8 sps:$4 sm:$0xff]  }
  0x39   :  { %430 = vmatprep.subr.bf16.mxu0 %v2057_v2  ;;  %v2066_v8 = vld [vmem:[%s3153_s3 + $0x44] ss:$8 sps:$4 sm:$0xff]   ;;  %v2068_v9 = vld [vmem:[%s3153_s3 + $0x40] ss:$8 sps:$4 sm:$0xff]   ;;  %v2069_v10 = vld [vmem:[%s3153_s3 + $0x54] ss:$8 sps:$4 sm:$0xff]  }
  0x3a   :  { %v2071_v11 = vld [vmem:[%s3153_s3 + $0x50] ss:$8 sps:$4 sm:$0xff]   ;;  %v2072_v12 = vld [vmem:[%s3153_s3 + $0x64] ss:$8 sps:$4 sm:$0xff]   ;;  %v2074_v14 = vld [vmem:[%s3153_s3 + $0x60] ss:$8 sps:$4 sm:$0xff]  }
  0x3b   :  { %v2104_v13 = vld [vmem:[#allocation2 + $0x4] ss:$12 sps:$4 sm:$0xff]   ;;  %v2075_v15 = vld [vmem:[%s3153_s3 + $0x74] ss:$8 sps:$4 sm:$0xff]   ;;  %v2080_v18 = vld [vmem:[%s3153_s3 + $0x80] ss:$8 sps:$4 sm:$0xff]  }
  0x3c   :  { %431 = vmatpush1.bf16.msra.mxu0 %v2059_v3  ;;  %460 = vmatprep.mubr.bf16.mxu0 %v2104_v13  ;;  %v2077_v16 = vld [vmem:[%s3153_s3 + $0x70] ss:$8 sps:$4 sm:$0xff]   ;;  %v2078_v17 = vld [vmem:[%s3153_s3 + $0x84] ss:$8 sps:$4 sm:$0xff]   ;;  %v2081_v19 = vld [vmem:[%s3153_s3 + $0x94] ss:$8 sps:$4 sm:$0xff]  }
  0x3d   :  { %432 = vmatprep.subr.bf16.mxu0 %v2060_v4  ;;  %v2083_v20 = vld [vmem:[%s3153_s3 + $0x90] ss:$8 sps:$4 sm:$0xff]   ;;  %v2084_v21 = vld [vmem:[%s3153_s3 + $0xa4] ss:$8 sps:$4 sm:$0xff]   ;;  %v2086_v22 = vld [vmem:[%s3153_s3 + $0xa0] ss:$8 sps:$4 sm:$0xff]  }
  0x3e   :  { %v2087_v23 = vld [vmem:[%s3153_s3 + $0xb4] ss:$8 sps:$4 sm:$0xff]   ;;  %v2089_v24 = vld [vmem:[%s3153_s3 + $0xb0] ss:$8 sps:$4 sm:$0xff]   ;;  %v2090_v25 = vld [vmem:[%s3153_s3 + $0xc4] ss:$8 sps:$4 sm:$0xff]  }
  0x3f   :  { %v2092_v26 = vld [vmem:[%s3153_s3 + $0xc0] ss:$8 sps:$4 sm:$0xff]   ;;  %v2093_v27 = vld [vmem:[%s3153_s3 + $0xd4] ss:$8 sps:$4 sm:$0xff]   ;;  %v2095_v28 = vld [vmem:[%s3153_s3 + $0xd0] ss:$8 sps:$4 sm:$0xff]  }
  0x40   :  { %433 = vmatpush1.bf16.msra.mxu0 %v2062_v5  ;;  %v2096_v29 = vld [vmem:[%s3153_s3 + $0xe4] ss:$8 sps:$4 sm:$0xff]   ;;  %v2098_v30 = vld [vmem:[%s3153_s3 + $0xe0] ss:$8 sps:$4 sm:$0xff]   ;;  %v2099_v31 = vld [vmem:[%s3153_s3 + $0xf4] ss:$8 sps:$4 sm:$0xff]  }
  0x41   :  { %434 = vmatprep.subr.bf16.mxu0 %v2063_v6  ;;  %v2181_v32 = vld [vmem:[%s3155_s5 + $0x4] ss:$8 sps:$4 sm:$0xff]   ;;  %v2183_v33 = vld [vmem:[%s3155_s5] ss:$8 sps:$4 sm:$0xff]   ;;  %v2101_v34 = vld [vmem:[%s3153_s3 + $0xf0] ss:$8 sps:$4 sm:$0xff]  }
  0x42   :  { %909 = vmatprep.subr.bf16.mxu1 %v2181_v32  ;;  %v2184_v35 = vld [vmem:[%s3155_s5 + $0x14] ss:$8 sps:$4 sm:$0xff]   ;;  %v2107_v36 = vld [vmem:[%s3153_s3 + $0x104] ss:$8 sps:$4 sm:$0xff]   ;;  %v2186_v37 = vld [vmem:[%s3155_s5 + $0x10] ss:$8 sps:$4 sm:$0xff]  }
  0x43   :  { %910 = vmatpush1.bf16.msra.mxu1 %v2183_v33  ;;  %v2187_v38 = vld [vmem:[%s3155_s5 + $0x24] ss:$8 sps:$4 sm:$0xff]   ;;  %v2105_v40 = vld [vmem:[%s3153_s3 + $0x100] ss:$8 sps:$4 sm:$0xff]   ;;  %v2110_v41 = vld [vmem:[%s3153_s3 + $0x114] ss:$8 sps:$4 sm:$0xff]  }
  0x44   :  { %435 = vmatpush1.bf16.msra.mxu0 %v2065_v7  ;;  %911 = vmatprep.subr.bf16.mxu1 %v2184_v35  ;;  %v2102_v39 = vld [vmem:[#allocation2] ss:$12 sps:$4 sm:$0xff]   ;;  %v2190_v43 = vld [vmem:[%s3155_s5 + $0x34] ss:$8 sps:$4 sm:$0xff]   ;;  %v2108_v44 = vld [vmem:[%s3153_s3 + $0x110] ss:$8 sps:$4 sm:$0xff]  }
  0x45   :  { %436 = vmatprep.subr.bf16.mxu0 %v2066_v8  ;;  %v2189_v42 = vld [vmem:[%s3155_s5 + $0x20] ss:$8 sps:$4 sm:$0xff]   ;;  %v2399_v45 = vmov 0   ;;  %v2113_v46 = vld [vmem:[%s3153_s3 + $0x124] ss:$8 sps:$4 sm:$0xff]   ;;  %vm905_vm0 = vcmask 523264  }
  0x46   :  { %v2192_v47 = vld [vmem:[%s3155_s5 + $0x30] ss:$8 sps:$4 sm:$0xff]   ;;  %v2111_v48 = vld [vmem:[%s3153_s3 + $0x120] ss:$8 sps:$4 sm:$0xff]   ;;  %v2193_v49 = vld [vmem:[%s3155_s5 + $0x44] ss:$8 sps:$4 sm:$0xff]  }
  0x47   :  { %912 = vmatpush1.bf16.msra.mxu1 %v2186_v37  ;;  %v2116_v50 = vld [vmem:[%s3153_s3 + $0x134] ss:$8 sps:$4 sm:$0xff]   ;;  %v2195_v51 = vld [vmem:[%s3155_s5 + $0x40] ss:$8 sps:$4 sm:$0xff]   ;;  %v2114_v53 = vld [vmem:[%s3153_s3 + $0x130] ss:$8 sps:$4 sm:$0xff]  }
  0x48   :  { %437 = vmatpush1.bf16.msra.mxu0 %v2068_v9  ;;  %913 = vmatprep.subr.bf16.mxu1 %v2187_v38  ;;  %v2196_v52 = vld [vmem:[%s3155_s5 + $0x54] ss:$8 sps:$4 sm:$0xff]   ;;  %v2119_v54 = vld [vmem:[%s3153_s3 + $0x144] ss:$8 sps:$4 sm:$0xff]   ;;  %v2198_v55 = vld [vmem:[%s3155_s5 + $0x50] ss:$8 sps:$4 sm:$0xff]  }
  0x49   :  { %438 = vmatprep.subr.bf16.mxu0 %v2069_v10  ;;  %v2199_v56 = vld [vmem:[%s3155_s5 + $0x64] ss:$8 sps:$4 sm:$0xff]   ;;  %v2117_v57 = vld [vmem:[%s3153_s3 + $0x140] ss:$8 sps:$4 sm:$0xff]   ;;  %v2122_v58 = vld [vmem:[%s3153_s3 + $0x154] ss:$8 sps:$4 sm:$0xff]  }
  0x4a   :  { %v2201_v59 = vld [vmem:[%s3155_s5 + $0x60] ss:$8 sps:$4 sm:$0xff]   ;;  %v2202_v60 = vld [vmem:[%s3155_s5 + $0x74] ss:$8 sps:$4 sm:$0xff]   ;;  %v2120_v61 = vld [vmem:[%s3153_s3 + $0x150] ss:$8 sps:$4 sm:$0xff]  }
  0x4b   :  { %914 = vmatpush1.bf16.msra.mxu1 %v2189_v42  ;;  %v2125_v62 = vld [vmem:[%s3153_s3 + $0x164] ss:$8 sps:$4 sm:$0xff]   ;;  %v2204_v63 = vld [vmem:[%s3155_s5 + $0x70] ss:$8 sps:$4 sm:$0xff]   ;;  %v2123_v1 = vld [vmem:[%s3153_s3 + $0x160] ss:$8 sps:$4 sm:$0xff]  }
  0x4c   :  { %439 = vmatpush1.bf16.msra.mxu0 %v2071_v11  ;;  %915 = vmatprep.subr.bf16.mxu1 %v2190_v43  ;;  %v2205_v0 = vld [vmem:[%s3155_s5 + $0x84] ss:$8 sps:$4 sm:$0xff]   ;;  %v2128_v2 = vld [vmem:[%s3153_s3 + $0x174] ss:$8 sps:$4 sm:$0xff]   ;;  %v2207_v3 = vld [vmem:[%s3155_s5 + $0x80] ss:$8 sps:$4 sm:$0xff]  }
  0x4d   :  { %440 = vmatprep.subr.bf16.mxu0 %v2072_v12  ;;  %v2208_v4 = vld [vmem:[%s3155_s5 + $0x94] ss:$8 sps:$4 sm:$0xff]   ;;  %v2126_v5 = vld [vmem:[%s3153_s3 + $0x170] ss:$8 sps:$4 sm:$0xff]   ;;  %v2131_v6 = vld [vmem:[%s3152_s2 + $0x4] ss:$8 sps:$4 sm:$0xff]  }
  0x4e   :  { %v2132_v7 = vld [vmem:[#allocation2 + $0x8] ss:$12 sps:$4 sm:$0xff]   ;;  %v2180_v9 = vld [vmem:[#allocation5 + $0x4] ss:$8 sps:$4 sm:$0xff]   ;;  %v2133_v11 = vld [vmem:[%s3152_s2 + $0x10] ss:$8 sps:$4 sm:$0xff]  }
  0x4f   :  { %916 = vmatpush1.bf16.msra.mxu1 %v2192_v47  ;;  %v2129_v8 = vld [vmem:[%s3152_s2] ss:$8 sps:$4 sm:$0xff]   ;;  %v2135_v10 = vld [vmem:[%s3152_s2 + $0x14] ss:$8 sps:$4 sm:$0xff]   ;;  %v2138_v12 = vld [vmem:[%s3152_s2 + $0x24] ss:$8 sps:$4 sm:$0xff]  }
  0x50   :  { %441 = vmatpush1.bf16.msra.mxu0 %v2074_v14  ;;  %917 = vmatprep.subr.bf16.mxu1 %v2193_v49  ;;  %v2136_v13 = vld [vmem:[%s3152_s2 + $0x20] ss:$8 sps:$4 sm:$0xff]   ;;  %v2141_v14 = vld [vmem:[%s3152_s2 + $0x34] ss:$8 sps:$4 sm:$0xff]   ;;  %v2168_v32 = vld [vmem:[%s3152_s2 + $0xc4] ss:$8 sps:$4 sm:$0xff]  }
  0x51   :  { %442 = vmatprep.subr.bf16.mxu0 %v2075_v15  ;;  %v2139_v15 = vld [vmem:[%s3152_s2 + $0x30] ss:$8 sps:$4 sm:$0xff]   ;;  %v2166_v33 = vld [vmem:[%s3152_s2 + $0xc0] ss:$8 sps:$4 sm:$0xff]   ;;  %v2177_v38 = vld [vmem:[%s3152_s2 + $0xf4] ss:$8 sps:$4 sm:$0xff]  }
  0x52   :  { %v2169_v35 = vld [vmem:[%s3152_s2 + $0xd0] ss:$8 sps:$4 sm:$0xff]   ;;  %v2172_v37 = vld [vmem:[%s3152_s2 + $0xe0] ss:$8 sps:$4 sm:$0xff]   ;;  %v2211_v42 = vld [vmem:[%s3155_s5 + $0xa4] ss:$8 sps:$4 sm:$0xff]  }
  0x53   :  { %918 = vmatpush1.bf16.msra.mxu1 %v2195_v51  ;;  %v2213_v43 = vld [vmem:[%s3155_s5 + $0xa0] ss:$8 sps:$4 sm:$0xff]   ;;  %v2219_v47 = vld [vmem:[%s3157_s7 + $0x4] ss:$8 sps:$4 sm:$0xff]   ;;  %vm2401_vm1 = vmmov 0   ;;  %s3177_s26 = sld [smem:[#allocation13_spill]] }
  0x54   :  { %443 = vmatpush1.bf16.msra.mxu0 %v2077_v16  ;;  %919 = vmatprep.subr.bf16.mxu1 %v2196_v52  ;;  %v2144_v16 = vld [vmem:[%s3152_s2 + $0x44] ss:$8 sps:$4 sm:$0xff]   ;;  %v727_v51 = vld [vmem:[%s3154_s4] sm:$0x3] }
  0x55   :  { %444 = vmatprep.subr.bf16.mxu0 %v2078_v17  ;;  %v2142_v17 = vld [vmem:[%s3152_s2 + $0x40] ss:$8 sps:$4 sm:$0xff]  }
  0x57   :  { %920 = vmatpush1.bf16.msra.mxu1 %v2198_v55 }
  0x58   :  { %445 = vmatpush1.bf16.msra.mxu0 %v2080_v18  ;;  %921 = vmatprep.subr.bf16.mxu1 %v2199_v56  ;;  %v2147_v18 = vld [vmem:[%s3152_s2 + $0x54] ss:$8 sps:$4 sm:$0xff]  }
  0x59   :  { %446 = vmatprep.subr.bf16.mxu0 %v2081_v19  ;;  %v2145_v19 = vld [vmem:[%s3152_s2 + $0x50] ss:$8 sps:$4 sm:$0xff]  }
  0x5b   :  { %922 = vmatpush1.bf16.msra.mxu1 %v2201_v59 }
  0x5c   :  { %447 = vmatpush1.bf16.msra.mxu0 %v2083_v20  ;;  %923 = vmatprep.subr.bf16.mxu1 %v2202_v60  ;;  %v2150_v20 = vld [vmem:[%s3152_s2 + $0x64] ss:$8 sps:$4 sm:$0xff]  }
  0x5d   :  { %448 = vmatprep.subr.bf16.mxu0 %v2084_v21  ;;  %v2148_v21 = vld [vmem:[%s3152_s2 + $0x60] ss:$8 sps:$4 sm:$0xff]  }
  0x5f   :  { %924 = vmatpush1.bf16.msra.mxu1 %v2204_v63 }
  0x60   :  { %449 = vmatpush1.bf16.msra.mxu0 %v2086_v22  ;;  %925 = vmatprep.subr.bf16.mxu1 %v2205_v0  ;;  %v2153_v22 = vld [vmem:[%s3152_s2 + $0x74] ss:$8 sps:$4 sm:$0xff]  }
  0x61   :  { %450 = vmatprep.subr.bf16.mxu0 %v2087_v23  ;;  %v2151_v23 = vld [vmem:[%s3152_s2 + $0x70] ss:$8 sps:$4 sm:$0xff]  }
  0x63   :  { %926 = vmatpush1.bf16.msra.mxu1 %v2207_v3 }
  0x64   :  { %451 = vmatpush1.bf16.msra.mxu0 %v2089_v24  ;;  %927 = vmatprep.subr.bf16.mxu1 %v2208_v4  ;;  %v2156_v24 = vld [vmem:[%s3152_s2 + $0x84] ss:$8 sps:$4 sm:$0xff]  }
  0x65   :  { %452 = vmatprep.subr.bf16.mxu0 %v2090_v25  ;;  %v2154_v25 = vld [vmem:[%s3152_s2 + $0x80] ss:$8 sps:$4 sm:$0xff]  }
  0x68   :  { %453 = vmatpush1.bf16.msra.mxu0 %v2092_v26  ;;  %v2159_v26 = vld [vmem:[%s3152_s2 + $0x94] ss:$8 sps:$4 sm:$0xff]  }
  0x69   :  { %454 = vmatprep.subr.bf16.mxu0 %v2093_v27  ;;  %v2157_v27 = vld [vmem:[%s3152_s2 + $0x90] ss:$8 sps:$4 sm:$0xff]  }
  0x6c   :  { %455 = vmatpush1.bf16.msra.mxu0 %v2095_v28  ;;  %v2162_v28 = vld [vmem:[%s3152_s2 + $0xa4] ss:$8 sps:$4 sm:$0xff]  }
  0x6d   :  { %456 = vmatprep.subr.bf16.mxu0 %v2096_v29  ;;  %v2160_v29 = vld [vmem:[%s3152_s2 + $0xa0] ss:$8 sps:$4 sm:$0xff]  }
  0x70   :  { %457 = vmatpush1.bf16.msra.mxu0 %v2098_v30  ;;  %v2165_v30 = vld [vmem:[%s3152_s2 + $0xb4] ss:$8 sps:$4 sm:$0xff]  }
  0x71   :  { %458 = vmatprep.subr.bf16.mxu0 %v2099_v31  ;;  %v2163_v31 = vld [vmem:[%s3152_s2 + $0xb0] ss:$8 sps:$4 sm:$0xff]  }
  0x74   :  { %459 = vmatpush1.bf16.msra.mxu0 %v2101_v34  ;;  %v2171_v34 = vld [vmem:[%s3152_s2 + $0xd4] ss:$8 sps:$4 sm:$0xff]  }
  0x75   :  { %471 = vmatprep.subr.bf16.mxu0 %v2107_v36  ;;  %v2174_v36 = vld [vmem:[%s3152_s2 + $0xe4] ss:$8 sps:$4 sm:$0xff]  }
  0x77   :  { %461 = vmatmul.mubr.bf16.vlgmr.msra.gmra.mrb[0].mxu0 %v2102_v39  ;;  %v2175_v39 = vld [vmem:[%s3152_s2 + $0xf0] ss:$8 sps:$4 sm:$0xff]  }
  0x78   :  { %472 = vmatpush1.bf16.msra.mxu0 %v2105_v40  ;;  %503 = vmatprep.mubr.bf16.mxu0 %v2399_v45  ;;  %v2178_v40 = vld [vmem:[#allocation5] ss:$8 sps:$4 sm:$0xff]  }
  0x79   :  { %473 = vmatprep.subr.bf16.mxu0 %v2110_v41  ;;  %v2210_v41 = vld [vmem:[%s3155_s5 + $0x90] ss:$8 sps:$4 sm:$0xff]  }
  0x7a   :  { %928 = vmatpush1.bf16.msra.mxu1 %v2210_v41 }
  0x7b   :  { %929 = vmatprep.subr.bf16.mxu1 %v2211_v42 }
  0x7c   :  { %474 = vmatpush1.bf16.msra.mxu0 %v2108_v44  ;;  %v2214_v44 = vld [vmem:[%s3155_s5 + $0xb4] ss:$8 sps:$4 sm:$0xff]  }
  0x7d   :  { %475 = vmatprep.subr.bf16.mxu0 %v2113_v46  ;;  %v2216_v46 = vld [vmem:[%s3155_s5 + $0xb0] ss:$8 sps:$4 sm:$0xff]  }
  0x7e   :  { %930 = vmatpush1.bf16.msra.mxu1 %v2213_v43 }
  0x7f   :  { %931 = vmatprep.subr.bf16.mxu1 %v2214_v44 }
  0x80   :  { %476 = vmatpush1.bf16.msra.mxu0 %v2111_v48  ;;  %v729_v48 = vlaneseq }
  0x81   :  { %477 = vmatprep.subr.bf16.mxu0 %v2116_v50 }
  0x82   :  { %932 = vmatpush1.bf16.msra.mxu1 %v2216_v46  ;;  %v730_v49 = vshrl.u32 %v729_v48, 7  ;;  %v2258_v48 = vld [vmem:[%s3159_s9 + $0x14] ss:$8 sps:$4 sm:$0xff]  }
  0x83   :  { %1117 = vmatprep.subr.bf16.mxu1 %v2219_v47  ;;  %v2253_v47 = vld [vmem:[%s3159_s9] ss:$8 sps:$4 sm:$0xff]  }
  0x84   :  { %478 = vmatpush1.bf16.msra.mxu0 %v2114_v53  ;;  %v2837_v50 = vsub.s32 0, %v730_v49  ;;  %v2842_v52 = vsub.s32 1, %v730_v49  ;;  %v2256_v49 = vld [vmem:[%s3159_s9 + $0x10] ss:$8 sps:$4 sm:$0xff]  }
  0x85   :  { %479 = vmatprep.subr.bf16.mxu0 %v2119_v54 }
  0x86   :  { %v732_v53 = vrot.slane %v727_v51, %v2837_v50  ;;  %v736_v54 = vrot.slane %v727_v51, %v2842_v52  ;;  %v2261_v51 = vld [vmem:[%s3159_s9 + $0x24] ss:$8 sps:$4 sm:$0xff]  }
  0x88   :  { %480 = vmatpush1.bf16.msra.mxu0 %v2117_v57 }
  0x89   :  { %481 = vmatprep.subr.bf16.mxu0 %v2122_v58 }
  0x8c   :  { %482 = vmatpush1.bf16.msra.mxu0 %v2120_v61 }
  0x8d   :  { %483 = vmatprep.subr.bf16.mxu0 %v2125_v62 }
  0x90   :  { %484 = vmatpush1.bf16.msra.mxu0 %v2123_v1 }
  0x91   :  { %485 = vmatprep.subr.bf16.mxu0 %v2128_v2 }
  0x94   :  { %486 = vmatpush1.bf16.msra.mxu0 %v2126_v5  ;;  %v2217_v5 = vld [vmem:[%s3157_s7] ss:$8 sps:$4 sm:$0xff]  }
  0x95   :  { %684 = vmatprep.subr.bf16.mxu0 %v2131_v6  ;;  %v2222_v6 = vld [vmem:[%s3157_s7 + $0x14] ss:$8 sps:$4 sm:$0xff]  }
  0x97   :  { %504 = vmatmul.mubr.bf16.vlgmr.msra.gmra.mrb[0].mxu0 %v2132_v7  ;;  %v2220_v7 = vld [vmem:[%s3157_s7 + $0x10] ss:$8 sps:$4 sm:$0xff]  }
  0x98   :  { %685 = vmatpush1.bf16.msra.mxu0 %v2129_v8  ;;  %716 = vmatprep.mubr.bf16.mxu0 %v2180_v9  ;;  %v2225_v8 = vld [vmem:[%s3157_s7 + $0x24] ss:$8 sps:$4 sm:$0xff]   ;;  %v2223_v9 = vld [vmem:[%s3157_s7 + $0x20] ss:$8 sps:$4 sm:$0xff]  }
  0x99   :  { %686 = vmatprep.subr.bf16.mxu0 %v2135_v10  ;;  %v2228_v10 = vld [vmem:[%s3157_s7 + $0x34] ss:$8 sps:$4 sm:$0xff]  }
  0x9c   :  { %687 = vmatpush1.bf16.msra.mxu0 %v2133_v11  ;;  %v2226_v11 = vld [vmem:[%s3157_s7 + $0x30] ss:$8 sps:$4 sm:$0xff]  }
  0x9d   :  { %688 = vmatprep.subr.bf16.mxu0 %v2138_v12  ;;  %v2231_v12 = vld [vmem:[%s3157_s7 + $0x44] ss:$8 sps:$4 sm:$0xff]  }
  0xa0   :  { %689 = vmatpush1.bf16.msra.mxu0 %v2136_v13  ;;  %v2229_v13 = vld [vmem:[%s3157_s7 + $0x40] ss:$8 sps:$4 sm:$0xff]  }
  0xa1   :  { %690 = vmatprep.subr.bf16.mxu0 %v2141_v14  ;;  %v2234_v14 = vld [vmem:[%s3157_s7 + $0x54] ss:$8 sps:$4 sm:$0xff]  }
  0xa4   :  { %691 = vmatpush1.bf16.msra.mxu0 %v2139_v15  ;;  %v2232_v15 = vld [vmem:[%s3157_s7 + $0x50] ss:$8 sps:$4 sm:$0xff]  }
  0xa5   :  { %692 = vmatprep.subr.bf16.mxu0 %v2144_v16  ;;  %v2237_v16 = vld [vmem:[%s3157_s7 + $0x64] ss:$8 sps:$4 sm:$0xff]  }
  0xa8   :  { %693 = vmatpush1.bf16.msra.mxu0 %v2142_v17  ;;  %v2235_v17 = vld [vmem:[%s3157_s7 + $0x60] ss:$8 sps:$4 sm:$0xff]  }
  0xa9   :  { %694 = vmatprep.subr.bf16.mxu0 %v2147_v18  ;;  %v2240_v18 = vld [vmem:[%s3157_s7 + $0x74] ss:$8 sps:$4 sm:$0xff]  }
  0xac   :  { %695 = vmatpush1.bf16.msra.mxu0 %v2145_v19  ;;  %v2238_v19 = vld [vmem:[%s3157_s7 + $0x70] ss:$8 sps:$4 sm:$0xff]  }
  0xad   :  { %696 = vmatprep.subr.bf16.mxu0 %v2150_v20  ;;  %v2243_v20 = vld [vmem:[%s3157_s7 + $0x84] ss:$8 sps:$4 sm:$0xff]  }
  0xb0   :  { %697 = vmatpush1.bf16.msra.mxu0 %v2148_v21  ;;  %v2241_v21 = vld [vmem:[%s3157_s7 + $0x80] ss:$8 sps:$4 sm:$0xff]  }
  0xb1   :  { %698 = vmatprep.subr.bf16.mxu0 %v2153_v22  ;;  %v2246_v22 = vld [vmem:[%s3157_s7 + $0x94] ss:$8 sps:$4 sm:$0xff]  }
  0xb4   :  { %699 = vmatpush1.bf16.msra.mxu0 %v2151_v23  ;;  %v2244_v23 = vld [vmem:[%s3157_s7 + $0x90] ss:$8 sps:$4 sm:$0xff]  }
  0xb5   :  { %700 = vmatprep.subr.bf16.mxu0 %v2156_v24  ;;  %v2249_v24 = vld [vmem:[%s3157_s7 + $0xa4] ss:$8 sps:$4 sm:$0xff]  }
  0xb8   :  { %701 = vmatpush1.bf16.msra.mxu0 %v2154_v25  ;;  %v2247_v25 = vld [vmem:[%s3157_s7 + $0xa0] ss:$8 sps:$4 sm:$0xff]  }
  0xb9   :  { %702 = vmatprep.subr.bf16.mxu0 %v2159_v26  ;;  %v2252_v26 = vld [vmem:[%s3157_s7 + $0xb4] ss:$8 sps:$4 sm:$0xff]  }
  0xbc   :  { %703 = vmatpush1.bf16.msra.mxu0 %v2157_v27  ;;  %v2250_v27 = vld [vmem:[%s3157_s7 + $0xb0] ss:$8 sps:$4 sm:$0xff]  }
  0xbd   :  { %704 = vmatprep.subr.bf16.mxu0 %v2162_v28  ;;  %v2255_v28 = vld [vmem:[%s3159_s9 + $0x4] ss:$8 sps:$4 sm:$0xff]  }
  0xc0   :  { %705 = vmatpush1.bf16.msra.mxu0 %v2160_v29  ;;  %v773_v29 = vld [vmem:[%s3156_s6] sm:$0x3] }
  0xc1   :  { %706 = vmatprep.subr.bf16.mxu0 %v2165_v30  ;;  %v778_v30 = vrot.slane %v773_v29, %v2837_v50 }
  0xc4   :  { %707 = vmatpush1.bf16.msra.mxu0 %v2163_v31  ;;  %v782_v31 = vrot.slane %v773_v29, %v2842_v52 }
  0xc5   :  { %708 = vmatprep.subr.bf16.mxu0 %v2168_v32 }
  0xc8   :  { %709 = vmatpush1.bf16.msra.mxu0 %v2166_v33 }
  0xc9   :  { %710 = vmatprep.subr.bf16.mxu0 %v2171_v34 }
  0xcc   :  { %711 = vmatpush1.bf16.msra.mxu0 %v2169_v35 }
  0xcd   :  { %712 = vmatprep.subr.bf16.mxu0 %v2174_v36 }
  0xd0   :  { %713 = vmatpush1.bf16.msra.mxu0 %v2172_v37 }
  0xd1   :  { %714 = vmatprep.subr.bf16.mxu0 %v2177_v38 }
  0xd4   :  { %715 = vmatpush1.bf16.msra.mxu0 %v2175_v39 }
  0xd5   :  { %1624 = vmatprep.subr.bf16.mxu0 %v2399_v45 }
  0xd7   :  { %717 = vmatmul.mubr.bf16.vlgmr.msra.gmra.mrb[0].mxu0 %v2178_v40 }
 0x1aa   :  { %v718_v55 = vpop.f32.mrb[0].mxu0 }
 0x1ab   :  { %v739_v56 = vadd.f32 %v732_v53, %v718_v55  ;;  %v720_v57 = vpop.f32.mrb[1].mxu0  ;;  %v2262_v55 = vld [vmem:[%s3159_s9 + $0x30] ss:$8 sps:$4 sm:$0xff]  }
 0x1ac   :  { %v740_v58 = vadd.f32 %v736_v54, %v720_v57  ;;  %v722_v59 = vpop.f32.mrb[2].mxu0  ;;  %v2265_v57 = vld [vmem:[%s3159_s9 + $0x40] ss:$8 sps:$4 sm:$0xff]  }
 0x1ad   :  { %v741_v60 = vadd.f32 %v732_v53, %v722_v59  ;;  %v724_v61 = vpop.f32.mrb[3].mxu0  ;;  %v743_v63 = vmax.f32 %v739_v56, 0.0  ;;  %v2259_v53 = vld [vmem:[%s3159_s9 + $0x20] ss:$8 sps:$4 sm:$0xff]   ;;  %v2267_v56 = vld [vmem:[%s3159_s9 + $0x44] ss:$8 sps:$4 sm:$0xff]  }
 0x1ae   :  { %v742_v62 = vadd.f32 %v736_v54, %v724_v61  ;;  %v744_v1 = vmax.f32 %v740_v58, 0.0  ;;  %v2264_v54 = vld [vmem:[%s3159_s9 + $0x34] ss:$8 sps:$4 sm:$0xff]   ;;  %v2268_v59 = vld [vmem:[%s3159_s9 + $0x50] ss:$8 sps:$4 sm:$0xff]  }
 0x1af   :  { %v745_v0 = vmax.f32 %v741_v60, 0.0  ;;  %v2270_v58 = vld [vmem:[%s3159_s9 + $0x54] ss:$8 sps:$4 sm:$0xff]   ;;  %v2273_v60 = vld [vmem:[%s3159_s9 + $0x64] ss:$8 sps:$4 sm:$0xff]  }
 0x1b0   :  { %v746_v2 = vmax.f32 %v742_v62, 0.0  ;;  %v2271_v61 = vld [vmem:[%s3159_s9 + $0x60] ss:$8 sps:$4 sm:$0xff]   ;;  %v2276_v62 = vld [vmem:[%s3159_s9 + $0x74] ss:$8 sps:$4 sm:$0xff]  }
 0x1b1   :  { %v747_v3 = vpack.c.bf16 %v745_v0, %v743_v63  ;;  %v2274_v63 = vld [vmem:[%s3159_s9 + $0x70] ss:$8 sps:$4 sm:$0xff]   ;;  %v2279_v0 = vld [vmem:[%s3159_s9 + $0x84] ss:$8 sps:$4 sm:$0xff]  }
 0x1b2   :  { %v748_v4 = vpack.c.bf16 %v746_v2, %v744_v1  ;;  %v2277_v1 = vld [vmem:[%s3159_s9 + $0x80] ss:$8 sps:$4 sm:$0xff]   ;;  %v2282_v2 = vld [vmem:[%s3159_s9 + $0x94] ss:$8 sps:$4 sm:$0xff]  }
 0x1b4   :  { %1911 = vmatprep.mubr.msk.bf16.mxu1 %vm905_vm0, %v748_v4  ;;  %v2285_v4 = vld [vmem:[%s3159_s9 + $0xa4] ss:$8 sps:$4 sm:$0xff]  }
 0x1b5   :  { %942 = vmatmul.mubr.bf16.vlgmr.msra.gmra.mrb[0].mxu1 %v747_v3  ;;  %v2280_v3 = vld [vmem:[%s3159_s9 + $0x90] ss:$8 sps:$4 sm:$0xff]  }
 0x1b6   :  { %1118 = vmatpush1.bf16.msra.mxu1 %v2217_v5  ;;  %v2283_v5 = vld [vmem:[%s3159_s9 + $0xa0] ss:$8 sps:$4 sm:$0xff]  }
 0x1b7   :  { %1119 = vmatprep.subr.bf16.mxu1 %v2222_v6  ;;  %v2288_v6 = vld [vmem:[%s3159_s9 + $0xb4] ss:$8 sps:$4 sm:$0xff]  }
 0x1ba   :  { %1120 = vmatpush1.bf16.msra.mxu1 %v2220_v7  ;;  %v2286_v7 = vld [vmem:[%s3159_s9 + $0xb0] ss:$8 sps:$4 sm:$0xff]  }
 0x1bb   :  { %1121 = vmatprep.subr.bf16.mxu1 %v2225_v8  ;;  %v2290_v8 = vld [vmem:[%s3163_s13] sm:$0xff]  }
 0x1bc   :  { %1625 = vmatpush1.bf16.msra.mxu0 %v2290_v8  ;;  %v2318_v8 = vld [vmem:[%s3165_s15 + $0x28] sm:$0xff]  }
 0x1bd   :  { %1626 = vmatprep.subr.bf16.mxu0 %v2399_v45 }
 0x1be   :  { %1122 = vmatpush1.bf16.msra.mxu1 %v2223_v9  ;;  %v2292_v9 = vld [vmem:[%s3163_s13 + $0x8] sm:$0xff]  }
 0x1bf   :  { %1123 = vmatprep.subr.bf16.mxu1 %v2228_v10  ;;  %v2294_v10 = vld [vmem:[%s3163_s13 + $0x10] sm:$0xff]  }
 0x1c0   :  { %1627 = vmatpush1.bf16.msra.mxu0 %v2292_v9  ;;  %v2319_v9 = vld [vmem:[%s3165_s15 + $0x30] sm:$0xff]  }
 0x1c1   :  { %1628 = vmatprep.subr.bf16.mxu0 %v2399_v45 }
 0x1c2   :  { %1124 = vmatpush1.bf16.msra.mxu1 %v2226_v11  ;;  %v2296_v11 = vld [vmem:[%s3163_s13 + $0x18] sm:$0xff]  }
 0x1c3   :  { %1125 = vmatprep.subr.bf16.mxu1 %v2231_v12  ;;  %v2298_v12 = vld [vmem:[%s3163_s13 + $0x20] sm:$0xff]  }
 0x1c4   :  { %1629 = vmatpush1.bf16.msra.mxu0 %v2294_v10  ;;  %v2320_v10 = vld [vmem:[%s3165_s15 + $0x38] sm:$0xff]  }
 0x1c5   :  { %1630 = vmatprep.subr.bf16.mxu0 %v2399_v45 }
 0x1c6   :  { %1126 = vmatpush1.bf16.msra.mxu1 %v2229_v13  ;;  %v2300_v13 = vld [vmem:[%s3163_s13 + $0x28] sm:$0xff]  }
 0x1c7   :  { %1127 = vmatprep.subr.bf16.mxu1 %v2234_v14  ;;  %v2302_v14 = vld [vmem:[%s3163_s13 + $0x30] sm:$0xff]  }
 0x1c8   :  { %1631 = vmatpush1.bf16.msra.mxu0 %v2296_v11  ;;  %v1976_v11 = vld [vmem:[%s3164_s14] ss:$0 sm:$0xff]  ;;  %s2402_s14 = smov [#allocation7]  }
 0x1c9   :  { %1632 = vmatprep.subr.bf16.mxu0 %v2399_v45  ;;  %s1789_s0 = sshll.u32 %s2402_s14, 4  ;;  %s1790_s0 = int_to_ptr.vmem [resolvable:$true] %s1789_s0 }
 0x1ca   :  { %1128 = vmatpush1.bf16.msra.mxu1 %v2232_v15  ;;  %v2304_v15 = vld [vmem:[%s3163_s13 + $0x38] sm:$0xff]   ;;  %s2365_s30 = scalar_lea.vmem %s1790_s0, 256  ;;  %p2370_p3 = scmp.lt.s32.totalorder %s1790_s0, %s1790_s0 }
 0x1cb   :  { %1129 = vmatprep.subr.bf16.mxu1 %v2237_v16  ;;  %v2306_v16 = vld [vmem:[%s3163_s13 + $0x40] sm:$0xff]   ;;  %p2366_p2 = scmp.ne.s32.totalorder %s1790_s0, %s2365_s30  ;;  %p2371_p4 = scmp.lt.s32.totalorder %s2365_s30, %s2365_s30 }
 0x1cc   :  { %1633 = vmatpush1.bf16.msra.mxu0 %v2298_v12 }
 0x1cd   :  { %1634 = vmatprep.subr.bf16.mxu0 %v2399_v45  ;;  %p2372_p5 = por %p2371_p4, %p2370_p3 }
 0x1ce   :  { %1130 = vmatpush1.bf16.msra.mxu1 %v2235_v17  ;;  %v982_v17 = vld [vmem:[%s3158_s8] sm:$0x3] }
 0x1cf   :  { %1131 = vmatprep.subr.bf16.mxu1 %v2240_v18  ;;  %v987_v18 = vrot.slane %v982_v17, %v2837_v50  ;;  %p2373_p6 = pnand %p2372_p5, %p2366_p2 }
 0x1d0   :  { %1635 = vmatpush1.bf16.msra.mxu0 %v2300_v13 }
 0x1d1   :  { %1636 = vmatprep.subr.bf16.mxu0 %v2399_v45 }
 0x1d2   :  { %1132 = vmatpush1.bf16.msra.mxu1 %v2238_v19  ;;  %v991_v19 = vrot.slane %v982_v17, %v2842_v52 }
 0x1d3   :  { %1133 = vmatprep.subr.bf16.mxu1 %v2243_v20 }
 0x1d4   :  { %1637 = vmatpush1.bf16.msra.mxu0 %v2302_v14 }
 0x1d5   :  { %1638 = vmatprep.subr.bf16.mxu0 %v2399_v45 }
 0x1d6   :  { %1134 = vmatpush1.bf16.msra.mxu1 %v2241_v21 }
 0x1d7   :  { %1135 = vmatprep.subr.bf16.mxu1 %v2246_v22 }
 0x1d8   :  { %1639 = vmatpush1.bf16.msra.mxu0 %v2304_v15 }
 0x1d9   :  { %1640 = vmatprep.subr.bf16.mxu0 %v2399_v45 }
 0x1da   :  { %1136 = vmatpush1.bf16.msra.mxu1 %v2244_v23 }
 0x1db   :  { %1137 = vmatprep.subr.bf16.mxu1 %v2249_v24 }
 0x1dc   :  { %1641 = vmatpush1.bf16.msra.mxu0 %v2306_v16 }
 0x1dd   :  { %1642 = vmatprep.subr.bf16.mxu0 %v2399_v45 }
 0x1de   :  { %1138 = vmatpush1.bf16.msra.mxu1 %v2247_v25 }
 0x1df   :  { %1139 = vmatprep.subr.bf16.mxu1 %v2252_v26 }
 0x1e2   :  { %1140 = vmatpush1.bf16.msra.mxu1 %v2250_v27 }
 0x1e3   :  { %1325 = vmatprep.subr.bf16.mxu1 %v2255_v28 }
 0x288   :  { %v943_v32 = vpop.f32.mrb[0].mxu1 }
 0x289   :  { %v944_v33 = vadd.f32 %v943_v32, %v778_v30  ;;  %v945_v34 = vpop.f32.mrb[1].mxu1 }
 0x28a   :  { %v946_v35 = vadd.f32 %v945_v34, %v782_v31  ;;  %v947_v36 = vpop.f32.mrb[2].mxu1  ;;  %v2289_v34 = vld [vmem:[%s3161_s11] sm:$0xff]  }
 0x28b   :  { %v948_v37 = vadd.f32 %v947_v36, %v778_v30  ;;  %v949_v38 = vpop.f32.mrb[3].mxu1  ;;  %v952_v40 = vmax.f32 %v944_v33, 0.0  ;;  %v2293_v36 = vld [vmem:[%s3161_s11 + $0x10] sm:$0xff]  }
 0x28c   :  { %v950_v39 = vadd.f32 %v949_v38, %v782_v31  ;;  %v953_v42 = vmax.f32 %v946_v35, 0.0  ;;  %v2291_v35 = vld [vmem:[%s3161_s11 + $0x8] sm:$0xff]   ;;  %v2297_v38 = vld [vmem:[%s3161_s11 + $0x20] sm:$0xff]  }
 0x28d   :  { %v954_v41 = vmax.f32 %v948_v37, 0.0  ;;  %v2295_v37 = vld [vmem:[%s3161_s11 + $0x18] sm:$0xff]  }
 0x28e   :  { %v955_v43 = vmax.f32 %v950_v39, 0.0  ;;  %v2299_v39 = vld [vmem:[%s3161_s11 + $0x28] sm:$0xff]  }
 0x28f   :  { %v956_v44 = vpack.c.bf16 %v954_v41, %v952_v40  ;;  %v2301_v40 = vld [vmem:[%s3161_s11 + $0x30] sm:$0xff]   ;;  %v2303_v41 = vld [vmem:[%s3161_s11 + $0x38] sm:$0xff]  }
 0x290   :  { %v957_v46 = vpack.c.bf16 %v955_v43, %v953_v42  ;;  %v2305_v42 = vld [vmem:[%s3161_s11 + $0x40] sm:$0xff]   ;;  %v2307_v43 = vld [vmem:[%s3161_s11 + $0x48] sm:$0xff]  }
 0x292   :  { %1936 = vmatprep.mubr.msk.bf16.mxu1 %vm905_vm0, %v957_v46  ;;  %v2309_v46 = vld [vmem:[%s3161_s11 + $0x50] sm:$0xff]  }
 0x293   :  { %1150 = vmatmul.mubr.bf16.vlgmr.msra.gmra.mrb[4].mxu1 %v956_v44  ;;  %v2308_v44 = vld [vmem:[%s3163_s13 + $0x48] sm:$0xff]  }
 0x294   :  { %1326 = vmatpush1.bf16.msra.mxu1 %v2253_v47  ;;  %1643 = vmatpush1.bf16.msra.mxu0 %v2308_v44  ;;  %v2310_v47 = vld [vmem:[%s3163_s13 + $0x50] sm:$0xff]  }
 0x295   :  { %1327 = vmatprep.subr.bf16.mxu1 %v2258_v48  ;;  %1644 = vmatprep.subr.bf16.mxu0 %v2399_v45  ;;  %v2311_v48 = vld [vmem:[%s3161_s11 + $0x58] sm:$0xff]  }
 0x298   :  { %1328 = vmatpush1.bf16.msra.mxu1 %v2256_v49  ;;  %1645 = vmatpush1.bf16.msra.mxu0 %v2310_v47  ;;  %v2312_v49 = vld [vmem:[%s3163_s13 + $0x58] sm:$0xff]  }
 0x299   :  { %1329 = vmatprep.subr.bf16.mxu1 %v2261_v51  ;;  %1646 = vmatprep.subr.bf16.mxu0 %v2399_v45  ;;  %v2400_v51 = vmov 0.0  }
 0x29c   :  { %1330 = vmatpush1.bf16.msra.mxu1 %v2259_v53  ;;  %1647 = vmatpush1.bf16.msra.mxu0 %v2312_v49  ;;  %v1190_v53 = vld [vmem:[%s3160_s10] sm:$0x3] }
 0x29d   :  { %1331 = vmatprep.subr.bf16.mxu1 %v2264_v54  ;;  %v1195_v54 = vrot.slane %v1190_v53, %v2837_v50  ;;  %v2313_v50 = vld [vmem:[%s3165_s15] sm:$0xff]  }
 0x2a0   :  { %1332 = vmatpush1.bf16.msra.mxu1 %v2262_v55 }
 0x2a1   :  { %1333 = vmatprep.subr.bf16.mxu1 %v2267_v56 }
 0x2a4   :  { %1334 = vmatpush1.bf16.msra.mxu1 %v2265_v57 }
 0x2a5   :  { %1335 = vmatprep.subr.bf16.mxu1 %v2270_v58 }
 0x2a8   :  { %1336 = vmatpush1.bf16.msra.mxu1 %v2268_v59 }
 0x2a9   :  { %1337 = vmatprep.subr.bf16.mxu1 %v2273_v60 }
 0x2ac   :  { %1338 = vmatpush1.bf16.msra.mxu1 %v2271_v61 }
 0x2ad   :  { %1339 = vmatprep.subr.bf16.mxu1 %v2276_v62 }
 0x2b0   :  { %1340 = vmatpush1.bf16.msra.mxu1 %v2274_v63 }
 0x2b1   :  { %1341 = vmatprep.subr.bf16.mxu1 %v2279_v0 }
 0x2b4   :  { %1342 = vmatpush1.bf16.msra.mxu1 %v2277_v1 }
 0x2b5   :  { %1343 = vmatprep.subr.bf16.mxu1 %v2282_v2 }
 0x2b8   :  { %1344 = vmatpush1.bf16.msra.mxu1 %v2280_v3 }
 0x2b9   :  { %1345 = vmatprep.subr.bf16.mxu1 %v2285_v4 }
 0x2bc   :  { %1346 = vmatpush1.bf16.msra.mxu1 %v2283_v5  ;;  %v2315_v5 = vld [vmem:[%s3165_s15 + $0x10] sm:$0xff]  }
 0x2bd   :  { %1347 = vmatprep.subr.bf16.mxu1 %v2288_v6  ;;  %v2316_v6 = vld [vmem:[%s3165_s15 + $0x18] sm:$0xff]  }
 0x2c0   :  { %1348 = vmatpush1.bf16.msra.mxu1 %v2286_v7  ;;  %v2317_v7 = vld [vmem:[%s3165_s15 + $0x20] sm:$0xff]  }
 0x2c1   :  { %1480 = vmatprep.subr.bf16.mxu1 %v2399_v45 }
 0x366   :  { %v1151_v20 = vpop.f32.mrb[4].mxu1 }
 0x367   :  { %v1152_v21 = vadd.f32 %v1151_v20, %v987_v18  ;;  %v1153_v22 = vpop.f32.mrb[5].mxu1 }
 0x368   :  { %v1154_v23 = vadd.f32 %v1153_v22, %v991_v19  ;;  %v1155_v24 = vpop.f32.mrb[6].mxu1  ;;  %v1990_v22 = vld [vmem:[%s3177_s26] ss:$0 sm:$0xff] }
 0x369   :  { %v1156_v25 = vadd.f32 %v1155_v24, %v987_v18  ;;  %v1157_v26 = vpop.f32.mrb[7].mxu1  ;;  %v1160_v28 = vmax.f32 %v1152_v21, 0.0  ;;  %v1962_v21 = vld [vmem:[%s3162_s12] ss:$0 sm:$0xff] }
 0x36a   :  { %v1158_v27 = vadd.f32 %v1157_v26, %v991_v19  ;;  %v1161_v30 = vmax.f32 %v1154_v23, 0.0  ;;  %v2028_v23 = vadd.f32 %v1990_v22, %v1962_v21 }
 0x36b   :  { %v1162_v29 = vmax.f32 %v1156_v25, 0.0 }
 0x36c   :  { %v1163_v31 = vmax.f32 %v1158_v27, 0.0 }
 0x36d   :  { %v1164_v32 = vpack.c.bf16 %v1162_v29, %v1160_v28 }
 0x36e   :  { %v1165_v33 = vpack.c.bf16 %v1163_v31, %v1161_v30 }
 0x370   :  { %1961 = vmatprep.mubr.msk.bf16.mxu1 %vm905_vm0, %v1165_v33 }
 0x371   :  { %1358 = vmatmul.mubr.bf16.vlgmr.msra.gmra.mrb[8].mxu1 %v1164_v32 }
 0x372   :  { %1481 = vmatpush1.bf16.msra.mxu1 %v2289_v34 }
 0x373   :  { %1482 = vmatprep.subr.bf16.mxu1 %v2399_v45 }
 0x376   :  { %1483 = vmatpush1.bf16.msra.mxu1 %v2291_v35 }
 0x377   :  { %1484 = vmatprep.subr.bf16.mxu1 %v2399_v45 }
 0x37a   :  { %1485 = vmatpush1.bf16.msra.mxu1 %v2293_v36 }
 0x37b   :  { %1486 = vmatprep.subr.bf16.mxu1 %v2399_v45 }
 0x37e   :  { %1487 = vmatpush1.bf16.msra.mxu1 %v2295_v37 }
 0x37f   :  { %1488 = vmatprep.subr.bf16.mxu1 %v2399_v45 }
 0x382   :  { %1489 = vmatpush1.bf16.msra.mxu1 %v2297_v38 }
 0x383   :  { %1490 = vmatprep.subr.bf16.mxu1 %v2399_v45 }
 0x386   :  { %1491 = vmatpush1.bf16.msra.mxu1 %v2299_v39 }
 0x387   :  { %1492 = vmatprep.subr.bf16.mxu1 %v2399_v45 }
 0x38a   :  { %1493 = vmatpush1.bf16.msra.mxu1 %v2301_v40 }
 0x38b   :  { %1494 = vmatprep.subr.bf16.mxu1 %v2399_v45 }
 0x38e   :  { %1495 = vmatpush1.bf16.msra.mxu1 %v2303_v41 }
 0x38f   :  { %1496 = vmatprep.subr.bf16.mxu1 %v2399_v45 }
 0x392   :  { %1497 = vmatpush1.bf16.msra.mxu1 %v2305_v42 }
 0x393   :  { %1498 = vmatprep.subr.bf16.mxu1 %v2399_v45 }
 0x396   :  { %1499 = vmatpush1.bf16.msra.mxu1 %v2307_v43 }
 0x397   :  { %1500 = vmatprep.subr.bf16.mxu1 %v2399_v45 }
 0x39a   :  { %1501 = vmatpush1.bf16.msra.mxu1 %v2309_v46 }
 0x39b   :  { %1502 = vmatprep.subr.bf16.mxu1 %v2399_v45  ;;  %v1199_v45 = vrot.slane %v1190_v53, %v2842_v52  ;;  %v2314_v52 = vld [vmem:[%s3165_s15 + $0x8] sm:$0xff]  }
 0x39e   :  { %1503 = vmatpush1.bf16.msra.mxu1 %v2311_v48 }
 0x39f   :  { %2008 = vmatprep.subr.bf16.mxu1 %v2400_v51 }
 0x444   :  { %v1359_v55 = vpop.f32.mrb[8].mxu1 }
 0x445   :  { %v1360_v56 = vadd.f32 %v1359_v55, %v1195_v54  ;;  %v1361_v57 = vpop.f32.mrb[9].mxu1 }
 0x446   :  { %v1362_v58 = vadd.f32 %v1361_v57, %v1199_v45  ;;  %v1363_v59 = vpop.f32.mrb[10].mxu1 }
 0x447   :  { %v1364_v60 = vadd.f32 %v1363_v59, %v1195_v54  ;;  %v1365_v61 = vpop.f32.mrb[11].mxu1  ;;  %v1368_v63 = vmax.f32 %v1360_v56, 0.0 }
 0x448   :  { %v1366_v62 = vadd.f32 %v1365_v61, %v1199_v45  ;;  %v1369_v1 = vmax.f32 %v1362_v58, 0.0 }
 0x449   :  { %v1370_v0 = vmax.f32 %v1364_v60, 0.0 }
 0x44a   :  { %v1371_v2 = vmax.f32 %v1366_v62, 0.0 }
 0x44b   :  { %v1372_v3 = vpack.c.bf16 %v1370_v0, %v1368_v63 }
 0x44c   :  { %v1373_v4 = vpack.c.bf16 %v1371_v2, %v1369_v1 }
 0x44e   :  { %1975 = vmatprep.mubr.msk.bf16.mxu1 %vm905_vm0, %v1373_v4  ;;  %1989 = vmatprep.mubr.msk.bf16.mxu0 %vm905_vm0, %v1373_v4 }
 0x44f   :  { %1513 = vmatmul.mubr.bf16.vlgmr.msra.gmra.mrb[12].mxu1 %v1372_v3  ;;  %1657 = vmatmul.mubr.bf16.vlgmr.msra.gmra.mrb[4].mxu0 %v1372_v3 }
 0x450   :  { %2009 = vmatpush3.bf16.msra.mxu1 %v2313_v50  ;;  %2024 = vmatprep.mubr.msk.bf16.mxu1 %vm2401_vm1, %v2400_v51 }
 0x451   :  { %2010 = vmatprep.subr.bf16.mxu1 %v2400_v51 }
 0x454   :  { %2011 = vmatpush3.bf16.msra.mxu1 %v2314_v52 }
 0x455   :  { %2012 = vmatprep.subr.bf16.mxu1 %v2400_v51 }
 0x458   :  { %2013 = vmatpush3.bf16.msra.mxu1 %v2315_v5 }
 0x459   :  { %2014 = vmatprep.subr.bf16.mxu1 %v2400_v51 }
 0x45c   :  { %2015 = vmatpush3.bf16.msra.mxu1 %v2316_v6 }
 0x45d   :  { %2016 = vmatprep.subr.bf16.mxu1 %v2400_v51 }
 0x460   :  { %2017 = vmatpush3.bf16.msra.mxu1 %v2317_v7 }
 0x461   :  { %2018 = vmatprep.subr.bf16.mxu1 %v2400_v51 }
 0x464   :  { %2019 = vmatpush3.bf16.msra.mxu1 %v2318_v8 }
 0x465   :  { %2020 = vmatprep.subr.bf16.mxu1 %v2400_v51 }
 0x468   :  { %2021 = vmatpush3.bf16.msra.mxu1 %v2319_v9 }
 0x469   :  { %2022 = vmatprep.subr.bf16.mxu1 %v2400_v51 }
 0x46c   :  { %2023 = vmatpush3.bf16.msra.mxu1 %v2320_v10 }
 0x522   :  { %v1658_v12 = vpop.f32.mrb[4].mxu0 }
 0x523   :  { %v1659_v13 = vadd.f32 %v1976_v11, %v1658_v12  ;;  %v1660_v14 = vpop.f32.mrb[5].mxu0 }
 0x524   :  { %v1661_v15 = vpop.f32.mrb[6].mxu0 }
 0x525   :  { %v1662_v16 = vadd.f32 %v1976_v11, %v1661_v15  ;;  %v1663_v17 = vpop.f32.mrb[7].mxu0  ;;  %v1665_v18 = vmax.f32 %v1659_v13, 0.0 }
 0x527   :  { %v1666_v19 = vmax.f32 %v1662_v16, 0.0 }
 0x529   :  { %v1667_v20 = vpack.c.bf16 %v1666_v19, %v1665_v18 }
 0x52b   :  { %2025 = vmatmul.mubr.bf16.vlgmr.msra.gmra.mrb[12].mxu1 %v1667_v20 }
 0x5fe   :  { %v1773_v24 = vpop.f32.mrb[12].mxu1 }
 0x5ff   :  { %v2029_v25 = vadd.f32 %v2028_v23, %v1773_v24  ;;  %v2026_v26 = vpop.f32.mrb[13].mxu1 }
 0x600   :  { %v1776_v27 = vpop.f32.mrb[14].mxu1 }
 0x601   :  { %1782 = vst [vmem:[#allocation7] sm:$0xff] %v2029_v25  ;;  %v2031_v28 = vadd.f32 %v2028_v23, %v1776_v27  ;;  %v2027_v29 = vpop.f32.mrb[15].mxu1 }
 0x603   :  { %1783 = vst [vmem:[#allocation7 + $0x8] sm:$0xff] %v2031_v28 }
 0x604   :  { %2376 = shalt.err (!%p2373_p6)
}
 0x605   :  { %s3178_s9 = sld [smem:[#allocation14_spill]] }
 0x60b   :  { %s2377_s11 = scalar_lea.hbm %s3178_s9, 256 }
 0x60c   :  { %p2378_p7 = scmp.ne.s32.totalorder %s3178_s9, %s2377_s11  ;;  %p2381_p8 = scmp.lt.u32.totalorder %s2377_s11, %s3178_s9 }
 0x60e   :  { %p2383_p9 = pnand %p2381_p8, %p2378_p7 }
 0x610   :  { %2386 = shalt.err (!%p2383_p9)
}
 0x611   :  { %1795 = dma.vmem_to_hbm [thread:$0]  %s1790_s0, 256, %s3178_s9, [#allocation4], %s2397_s25, %s2397_s25, %s2398_s28  }
 0x612   :  { %2391 = dma.done.wait [#allocation4], 256  }
 0x613   :  { %2392 = vsyncadd [#allocation4], 4294967040 }
 0x614   :  { %1799 = vsyncpa [#allocation3], 1 }
 0x615   :  { %1800 = vsyncpa [#allocation6], 1 }
 0x616   :  { %1801 = vsyncpa [#allocation4], 1 }

</bundles_post_ra>
